<compile_context>
chip_gen: v5e
topology: v5e:2x2
jax: 0.10.0
libtpu: 0.0.40
codegen_flags: <defaults>
</compile_context>

<pallas_src>
import functools

import jax
import jax.numpy as jnp
from jax.experimental import pallas as pl
from jax.experimental.pallas import tpu as pltpu


def _round_up(x, m):
    return ((x + m - 1) // m) * m


_VMEM_LIMIT_CACHE = None


def _vmem_limit_bytes():
    """Per-generation VMEM budget: physical capacity minus headroom.

    v5e/v6e -> ~120 MiB, v7x -> ~56 MiB.  Falls back to a v7x-safe 64 MiB if
    the hardware query is unavailable.
    """
    global _VMEM_LIMIT_CACHE
    if _VMEM_LIMIT_CACHE is None:
        try:
            cap = int(pltpu.get_tpu_info().vmem_capacity_bytes)
        except Exception:
            cap = 64 * 1024 * 1024
        if cap < 32 * 1024 * 1024:
            cap = 64 * 1024 * 1024
        cap = min(cap, 128 * 1024 * 1024)
        _VMEM_LIMIT_CACHE = cap - 8 * 1024 * 1024  # headroom for compiler scratch
    return _VMEM_LIMIT_CACHE


def _pick_nk_tiles(K, N, w_dtype, *, tn_req=256, tk_cap=None):
    """Choose (tn, tk) and the padded weight dims (Kp, Np) for this device.

    x is cast to the weight dtype on the call path, so one dtype governs both.
    """
    budget = _vmem_limit_bytes() - 8 * 1024 * 1024  # extra margin under the limit
    wbytes = jnp.dtype(w_dtype).itemsize
    tm_est = 16  # conservative sublane estimate (bf16 tile); batch is tiny anyway

    # --- N tile: lane-dense; guarantee >=2 j-programs when N allows so the
    # "parallel" j axis can shard across v7x's 2 TensorCores. ---
    Nr = _round_up(N, 128)
    tn = min(tn_req, Nr)
    if Nr >= 256 and Nr // tn < 2:
        tn = _round_up(-(-Nr // 2), 128)
    Np = _round_up(N, tn)

    # --- K tile: as large as the VMEM budget allows (amortize per-grid-step
    # overhead; each weight DMA should be many MiB). ---
    if tk_cap is None:
        tk_cap = 65536 if wbytes <= 2 else 32768
    K128 = _round_up(K, 128)
    # VMEM: 2x weight buffers + 2x resident-x buffers + out/bias + slack.
    fixed = 2 * tm_est * K128 * wbytes + 2 * tm_est * tn * 4 + (1 << 20)
    per_tk = 2 * tn * wbytes + 2 * tm_est * wbytes
    tk_fit = max(128, (budget - fixed) // per_tk)
    cap = max(128, min(tk_cap, tk_fit, K128))
    # Split K into equal 128-multiple chunks so Kp stays close to K (avoid
    # padding K up to a huge tk multiple).
    n_k = max(1, -(-K128 // cap))
    tk = _round_up(-(-K128 // n_k), 128)
    Kp = n_k * tk
    return tn, tk, Kp, Np


def _linear_kernel(x_ref, w_ref, b_ref, o_ref, *, tk):
    """One (tm, tn) f32 output tile; grid axis 2 reduces over K.

    o_ref is VMEM-resident across k (constant output block index) and doubles
    as the f32 accumulator; it is initialized with the bias at k == 0.
    x_ref holds the full (tm, Kp) row block; slice the current K chunk.
    """
    k = pl.program_id(2)

    @pl.when(k == 0)
    def _():
        o_ref[...] = jnp.broadcast_to(
            b_ref[...].astype(jnp.float32), o_ref.shape
        )

    x_blk = x_ref[:, pl.ds(pl.multiple_of(k * tk, 128), tk)]
    o_ref[...] += jnp.dot(x_blk, w_ref[...], preferred_element_type=jnp.float32)


@functools.partial(jax.jit, static_argnames=("tn", "tk"))
def linear_pallas(x, w_t, b, *, tn, tk):
    """Computes x @ w_t + b with f32 accumulation.

    x   : (M, K)   f32 or bf16 (cast done by the caller)
    w_t : (Kp, Np) pre-padded transposed weight, Kp % tk == 0, Np % tn == 0
    b   : (1, Np)  f32, pre-padded

    Returns (M, Np) float32 (caller slices the N padding away).
    """
    M, K = x.shape
    Kp, Np = w_t.shape
    # No per-call weight pad: a tile/shape mismatch would silently re-copy the
    # (huge) weight every forward, so fail loudly instead.
    assert Kp % tk == 0 and Np % tn == 0, "weight not pre-padded to tile multiples"
    assert Kp >= K, "weight K must be >= x K"
    assert b.shape == (1, Np)

    # Sublane rounding: bf16/fp16 packs 16 rows per vreg, f32 packs 8.
    sub = {1: 32, 2: 16}.get(jnp.dtype(x.dtype).itemsize, 8)
    tm = _round_up(min(M, 128), sub)
    Mp = _round_up(M, tm)

    xp = jnp.pad(x, ((0, Mp - M), (0, Kp - K))) if (M, K) != (Mp, Kp) else x

    grid = (Mp // tm, Np // tn, Kp // tk)
    kernel = functools.partial(_linear_kernel, tk=tk)

    out = pl.pallas_call(
        kernel,
        out_shape=jax.ShapeDtypeStruct((Mp, Np), jnp.float32),
        grid_spec=pltpu.PrefetchScalarGridSpec(
            num_scalar_prefetch=0,
            grid=grid,
            in_specs=[
                # x: full row block, VMEM-resident across j and k.
                pl.BlockSpec((tm, Kp), lambda i, j, k: (i, 0)),
                # W^T: the streamed weight tile (the only real HBM traffic).
                pl.BlockSpec((tk, tn), lambda i, j, k: (k, j)),
                # bias tile (tiny).
                pl.BlockSpec((1, tn), lambda i, j, k: (0, j)),
            ],
            out_specs=pl.BlockSpec((tm, tn), lambda i, j, k: (i, j)),
        ),
        compiler_params=pltpu.CompilerParams(
            dimension_semantics=("parallel", "parallel", "arbitrary"),
            vmem_limit_bytes=_vmem_limit_bytes(),
        ),
    )(xp, w_t, b)

    return out[:M] if Mp != M else out


class SimpleNNPallas:
    """JAX/Pallas port of Simple_NN: one Linear(in_features, max_vector)."""

    def __init__(self, in_features, max_vector, key, *,
                 weight_dtype=jnp.bfloat16, tn=256, tk=None):
        # Matches PyTorch _initialize_weights for nn.Linear:
        #   weight ~ Normal(0, 0.01), bias = 0
        # weight_dtype=bf16 (default) halves the weight HBM stream (~2x end-to-
        # end since the kernel is weight-bandwidth bound); pass jnp.float32 to
        # match the PyTorch reference bit-for-bit in the multiplicands.
        self.in_features = in_features
        self.max_vector = max_vector

        tn_eff, tk_eff, kp, np_ = _pick_nk_tiles(
            in_features, max_vector, weight_dtype, tn_req=tn, tk_cap=tk
        )
        self.tn, self.tk = tn_eff, tk_eff

        w = 0.01 * jax.random.normal(
            key, (max_vector, in_features), dtype=jnp.float32
        )
        # Pre-pad once (zeros) to exact tile multiples so the per-call path
        # never copies the big weight.
        self.w_t = jnp.pad(
            w.T, ((0, kp - in_features), (0, np_ - max_vector))
        ).astype(weight_dtype)                               # (Kp, Np)
        self.b = jnp.zeros((1, np_), jnp.float32)            # (1, Np)

    def __call__(self, x):
        # x: (B, in_features) -> (B, max_vector)
        x = x.astype(self.w_t.dtype)   # bf16 on the default path; no-op for f32
        out = linear_pallas(x, self.w_t, self.b, tn=self.tn, tk=self.tk)
        return out[:, : self.max_vector]


if __name__ == "__main__":
    key = jax.random.PRNGKey(0)
    k_w, k_x, k_w2, k_x2, k_b2 = jax.random.split(key, 5)

    # --- test 1: default bf16-weight path, nicely shaped small stand-in ------
    BATCH, IN_FEATURES, MAX_VECTOR = 8, 512, 256   # real module uses 200000 in
    model = SimpleNNPallas(IN_FEATURES, MAX_VECTOR, k_w)   # bf16 weights
    x = jax.random.normal(k_x, (BATCH, IN_FEATURES), dtype=jnp.float32)

    out = jax.block_until_ready(model(x))
    # Reference follows the same dtype path: bf16 inputs, f32 accumulation.
    xb = x.astype(model.w_t.dtype).astype(jnp.float32)
    wb = model.w_t[:IN_FEATURES, :MAX_VECTOR].astype(jnp.float32)
    ref = xb @ wb + model.b[0, :MAX_VECTOR]
    assert out.shape == (BATCH, MAX_VECTOR)
    assert jnp.allclose(out, ref, atol=1e-3, rtol=1e-3)

    # --- test 2: f32 weights, ragged shapes, nonzero bias --------------------
    # (mirrors the real in_features=200000, which is not a multiple of 128)
    B2, K2, N2 = 3, 300, 100
    model2 = SimpleNNPallas(K2, N2, k_w2, weight_dtype=jnp.float32)
    np2 = model2.b.shape[1]
    bias2 = 0.1 * jax.random.normal(k_b2, (1, N2), dtype=jnp.float32)
    model2.b = jnp.pad(bias2, ((0, 0), (0, np2 - N2)))
    x2 = jax.random.normal(k_x2, (B2, K2), dtype=jnp.float32)

    out2 = jax.block_until_ready(model2(x2))
    ref2 = x2 @ model2.w_t[:K2, :N2] + model2.b[0, :N2]
    assert out2.shape == (B2, N2)
    assert jnp.allclose(out2, ref2, atol=1e-4, rtol=1e-4)

    print("KERNEL_OK")
</pallas_src>

<mosaic_0001>
module attributes {stable_mosaic.version = 11 : i64} {
  func.func @_linear_kernel(%arg0: i32, %arg1: i32, %arg2: i32, %arg3: memref<16x512xbf16, #tpu.memory_space<vmem>>, %arg4: memref<512x128xbf16, #tpu.memory_space<vmem>>, %arg5: memref<1x128xf32, #tpu.memory_space<vmem>>, %arg6: memref<16x128xf32, #tpu.memory_space<vmem>>) attributes {dimension_semantics = [#tpu.dimension_semantics<parallel>, #tpu.dimension_semantics<parallel>, #tpu.dimension_semantics<arbitrary>], iteration_bounds = array<i64: 1, 2, 1>, scalar_prefetch = 0 : i64, scratch_operands = 0 : i64, tpu.core_type = #tpu.core_type<tc>, window_params = [{transform_indices = @transform_0, window_bounds = array<i64: 16, 512>}, {transform_indices = @transform_1, window_bounds = array<i64: 512, 128>}, {transform_indices = @transform_2, window_bounds = array<i64: 1, 128>}, {transform_indices = @transform_3, window_bounds = array<i64: 16, 128>}]} {
    %c0_i32 = arith.constant 0 : i32
    %0 = arith.cmpi eq, %arg2, %c0_i32 : i32
    %1 = arith.extui %0 : i1 to i32
    %c0_i32_0 = arith.constant 0 : i32
    %2 = arith.cmpi ne, %1, %c0_i32_0 : i32
    scf.if %2 {
      %c0_7 = arith.constant 0 : index
      %c0_8 = arith.constant 0 : index
      %12 = vector.load %arg5[%c0_7, %c0_8] : memref<1x128xf32, #tpu.memory_space<vmem>>, vector<1x128xf32>
      %13 = vector.shape_cast %12 : vector<1x128xf32> to vector<1x128xf32>
      %14 = vector.broadcast %13 : vector<1x128xf32> to vector<16x128xf32>
      %c0_9 = arith.constant 0 : index
      %c0_10 = arith.constant 0 : index
      %15 = vector.load %arg6[%c0_9, %c0_10] : memref<16x128xf32, #tpu.memory_space<vmem>>, vector<16x128xf32>
      tpu.vector_store %arg6[%c0_9, %c0_10], %14 {strides = array<i32>} : memref<16x128xf32, #tpu.memory_space<vmem>>, vector<16x128xf32>,
    } else {
    }
    %c512_i32 = arith.constant 512 : i32
    %3 = arith.muli %arg2, %c512_i32 : i32
    %4 = tpu.assume_multiple %3, 128 : i32
    %c0 = arith.constant 0 : index
    %5 = arith.index_cast %4 : i32 to index
    %6 = vector.load %arg3[%c0, %5] : memref<16x512xbf16, #tpu.memory_space<vmem>>, vector<16x512xbf16>
    %c0_1 = arith.constant 0 : index
    %c0_2 = arith.constant 0 : index
    %7 = vector.load %arg6[%c0_1, %c0_2] : memref<16x128xf32, #tpu.memory_space<vmem>>, vector<16x128xf32>
    %c0_3 = arith.constant 0 : index
    %c0_4 = arith.constant 0 : index
    %8 = vector.load %arg4[%c0_3, %c0_4] : memref<512x128xbf16, #tpu.memory_space<vmem>>, vector<512x128xbf16>
    %cst = arith.constant dense<0.000000e+00> : vector<16x128xf32>
    %9 = tpu.matmul %6, %8, %cst {dimension_numbers = #tpu.dot_dimension_numbers<[1], [0], [0], [1], [0, 0, 1, 1], [], []>} : vector<16x512xbf16>, vector<512x128xbf16>, vector<16x128xf32> -> vector<16x128xf32>
    %10 = arith.addf %7, %9 : vector<16x128xf32>
    %c0_5 = arith.constant 0 : index
    %c0_6 = arith.constant 0 : index
    %11 = vector.load %arg6[%c0_5, %c0_6] : memref<16x128xf32, #tpu.memory_space<vmem>>, vector<16x128xf32>
    tpu.vector_store %arg6[%c0_5, %c0_6], %10 {strides = array<i32>} : memref<16x128xf32, #tpu.memory_space<vmem>>, vector<16x128xf32>,
    return
  }
  func.func @transform_0(%arg0: i32, %arg1: i32, %arg2: i32) -> (i32, i32) {
    %c0_i32 = arith.constant 0 : i32
    %c0_i32_0 = arith.constant 0 : i32
    return %arg0, %c0_i32 : i32, i32
  }
  func.func @transform_1(%arg0: i32, %arg1: i32, %arg2: i32) -> (i32, i32) {
    %c0_i32 = arith.constant 0 : i32
    return %arg2, %arg1 : i32, i32
  }
  func.func @transform_2(%arg0: i32, %arg1: i32, %arg2: i32) -> (i32, i32) {
    %c0_i32 = arith.constant 0 : i32
    %c0_i32_0 = arith.constant 0 : i32
    return %c0_i32, %arg1 : i32, i32
  }
  func.func @transform_3(%arg0: i32, %arg1: i32, %arg2: i32) -> (i32, i32) {
    %c0_i32 = arith.constant 0 : i32
    return %arg0, %arg1 : i32, i32
  }
}

</mosaic_0001>

<bundles_post_ra>
// kernel: linear_pallas.1
= control target key start
LH: loop header
LB: loop body
LE: loop exit
PB: predicated region body
PF: predicated region fallthrough
CT: control target
= control target key end

     0   :  { %8 = vsyncpa [#allocation3], 0  ;;  %s1281_s0 = inlined_call_operand.vmem [shape: bf16[16,512], index: 0, kind: input, shape index: {}]   ;;  %s1282_s1 = inlined_call_operand.hbm [shape: bf16[512,256], index: 1, kind: input, shape index: {}]   ;;  %s1283_s2 = inlined_call_operand.vmem [shape: f32[1,256], index: 2, kind: input, shape index: {}]   ;;  %s1284_s3 = inlined_call_operand.vmem [shape: f32[16,256], index: 3, kind: output, shape index: {}]  }
   0x1   :  { %10 = vsyncpa [#allocation3 + $0x1], 0  ;;  %s1120_s12 = smov 0   ;;  %s1122_s13 = smov 0  }
   0x2   :  { %s1124_s14 = smov 0   ;;  %s1126_s15 = smov 0  }
   0x3   :  { %s1128_s16 = smov 0   ;;  %s1130_s17 = smov 0  }
   0x4 LB: > { %s762_s18 = sadd.s32 4294967295, %s1095_s17   ;;  %s31_s19 = sadd.s32 1, %s1091_s16  ;;  %s1095_s17 = sphi %s1130_s17, %s16_s17   ;;  %s1091_s16 = sphi %s1128_s16, %s1292_s16   ;;  %s1087_s15 = sphi %s1126_s15, %s1291_s15   ;;  %s1083_s14 = sphi %s1124_s14, %s1290_s14   ;;  %s1079_s13 = sphi %s1122_s13, %s1289_s13   ;;  %s1075_s12 = sphi %s1120_s12, %s1288_s12  }
   0x5   : > { %p33_p0 = scmp.ge.s32.totalorder %s31_s19, 2  ;;  %s70_s20 = sadd.s32 1, %s1083_s14 }
   0x6   : > { %p77_p1 = scmp.ne.s32.totalorder %s1083_s14, %s1079_s13  ;;  %p78_p2 = scmp.eq.s32.totalorder %s1095_s17, 0 }
   0x7   : > { %s1294_s19 = smov (%p33_p0, %s31_s19), 0  ;;  %p83_p4 = scmp.ne.s32.totalorder %s1079_s13, %s1075_s12 }
   0x8   : > { %p1156_p3 = por %p78_p2, %p77_p1  ;;  %s66_s22 = ssub.s32 %s1091_s16, %s1294_s19 }
   0x9   : > { %p84_p5 = scmp.eq.s32.totalorder %s762_s18, 0  ;;  %p68_p6 = scmp.eq.s32.totalorder %s66_s22, 0 }
   0xa   : > { %p135_p7 = scmp.eq.s32.totalorder %s762_s18, 1  ;;  %p962_p10 = scmp.lt.s32.totalorder %s1095_s17, 2 }
   0xb   : > { %p1163_p8 = por %p84_p5, %p83_p4  ;;  %s171_s26 = sand.u32 1, %s1083_s14  }
   0xc   : > { %s1168_s24 = scalar_select %p68_p6, %s1083_s14, %s70_s20  }
   0xd   : > { %p1170_p9 = por %p135_p7, %p77_p1  ;;  %s768_s27 = sshll.u32 %s1091_s16, 2 }
   0xe   : > { %s767_s28 = sshll.u32 %s171_s26, 8  ;;  %s182_s4 = scalar_lea.hbm %s1282_s1, %s768_s27 }
   0xf   : > { %s183_s5 = sshll.u32 %s182_s4, 4  ;;  %s175_s6 = scalar_lea.vmem [#allocation2], %s767_s28  ;;  %s184_s5 = int_to_ptr.hbm [resolvable:$true] %s183_s5 }
  0x10   : > { %s185_s7 = sshll.u32 %s175_s6, 4  ;;  %p959_p11 = pnand %p962_p10, %p1156_p3  ;;  %s186_s7 = int_to_ptr.vmem [resolvable:$true] %s185_s7 }
  0x11   : > { %p769_p12 = scmp.ge.s32.totalorder %s1095_s17, 1  ;;  %s172_s8 = scalar_lea.sflag [#allocation3], %s171_s26 }
  0x12   : > { %s1097_s9 = smov 128   ;;  %s1098_s10 = smov 64  }
  0x13   : > { %s1099_s11 = smov 4   ;;  %p199_p13 = scmp.lt.s32.totalorder %s1095_s17, 3 }
  0x14   : > { %961 = dma.hbm_to_vmem [thread:$0]  (!%p959_p11), %s184_s5, 4096, %s186_s7, %s172_s8, %s1097_s9, %s1098_s10, %s1099_s11  }
  0x15   : > { %p200_p0 = pnand %p769_p12, %p199_p13 }
  0x16   : > { %s1185_s12 = sand.u32 (!%p200_p0), 1, %s1079_s13  }
  0x17   : > { %203 = sbr.rel (%p200_p0) target bundleno = 218 (0xda), region = 32  ;;  %s770_s18 = sshll.u32 (!%p200_p0), %s1185_s12, 8 }
  0x18   : > { %s206_s20 = scalar_lea.sflag (!%p200_p0), [#allocation3], %s1185_s12  ;;  %s1189_s22 = scalar_lea.vmem (!%p200_p0), [#allocation2], %s770_s18 }
  0x1c   : > { %1070 = dma.done.wait (%p1163_p8), %s206_s20, 4096  }
  0x1d   : > { %1072 = vsyncadd (%p1163_p8), %s206_s20, 4294963200  ;;  %v931_v0 = vld [vmem:[%s1189_s22 + $0x38] sm:$0xff]  ;;  %v930_v4 = vld [vmem:[%s1189_s22 + $0x30] sm:$0xff]  ;;  %p249_p1 = scmp.lt.s32.totalorder %s1087_s15, 1  ;;  %s771_s26 = sshll.u32 %s1185_s12, 4 }
  0x1e   : > { %v939_v1 = vld [vmem:[%s1189_s22 + $0x78] sm:$0xff]  ;;  %550 = vmatpush.bf16.msra.mxu0 %v931_v0  ;;  %v938_v5 = vld [vmem:[%s1189_s22 + $0x70] sm:$0xff]  ;;  %v929_v8 = vld [vmem:[%s1189_s22 + $0x28] sm:$0xff]  ;;  %s240_s27 = scalar_lea.vmem [#allocation4], %s771_s26  ;;  %s917_s28 = sshll.u32 (%p1170_p9), %s1087_s15, 3 }
  0x1f   : > { %v947_v2 = vld [vmem:[%s1189_s22 + $0xb8] sm:$0xff]  ;;  %564 = vmatpush.bf16.msra.mxu1 %v939_v1  ;;  %v946_v6 = vld [vmem:[%s1189_s22 + $0xb0] sm:$0xff]  ;;  %v937_v9 = vld [vmem:[%s1189_s22 + $0x68] sm:$0xff]  ;;  %s250_s20 = scalar_select %p249_p1, %s1087_s15, 1 }
  0x20   : > { %v955_v3 = vld [vmem:[%s1189_s22 + $0xf8] sm:$0xff]  ;;  %578 = vmatpush.bf16.msra.mxu2 %v947_v2  ;;  %v954_v7 = vld [vmem:[%s1189_s22 + $0xf0] sm:$0xff]  ;;  %v945_v10 = vld [vmem:[%s1189_s22 + $0xa8] sm:$0xff]  ;;  %s621_s30 = scalar_lea.vmem (%p1170_p9), %s1284_s3, %s917_s28 }
  0x21   : > { %592 = vmatpush.bf16.msra.mxu3 %v955_v3  ;;  %v953_v11 = vld [vmem:[%s1189_s22 + $0xe8] sm:$0xff]  ;;  %v928_v12 = vld [vmem:[%s1189_s22 + $0x20] sm:$0xff]  ;;  %v927_v16 = vld [vmem:[%s1189_s22 + $0x18] sm:$0xff]  ;;  %s251_s23 = scalar_lea.vmem %s1283_s2, %s250_s20 }
  0x22   : > { %551 = vmatpush.bf16.msra.mxu0 %v930_v4  ;;  %v936_v13 = vld [vmem:[%s1189_s22 + $0x60] sm:$0xff]  ;;  %v935_v17 = vld [vmem:[%s1189_s22 + $0x58] sm:$0xff]  ;;  %v926_v20 = vld [vmem:[%s1189_s22 + $0x10] sm:$0xff] }
  0x23   : > { %565 = vmatpush.bf16.msra.mxu1 %v938_v5  ;;  %v944_v14 = vld [vmem:[%s1189_s22 + $0xa0] sm:$0xff]  ;;  %v943_v18 = vld [vmem:[%s1189_s22 + $0x98] sm:$0xff]  ;;  %v934_v21 = vld [vmem:[%s1189_s22 + $0x50] sm:$0xff] }
  0x24   : > { %579 = vmatpush.bf16.msra.mxu2 %v946_v6  ;;  %v952_v15 = vld [vmem:[%s1189_s22 + $0xe0] sm:$0xff]  ;;  %v951_v19 = vld [vmem:[%s1189_s22 + $0xd8] sm:$0xff]  ;;  %v942_v22 = vld [vmem:[%s1189_s22 + $0x90] sm:$0xff] }
  0x25   : > { %593 = vmatpush.bf16.msra.mxu3 %v954_v7  ;;  %v950_v23 = vld [vmem:[%s1189_s22 + $0xd0] sm:$0xff]  ;;  %v925_v24 = vld [vmem:[%s1189_s22 + $0x8] sm:$0xff]  ;;  %v924_v28 = vld [vmem:[%s1189_s22] sm:$0xff] }
  0x26   : > { %552 = vmatpush.bf16.msra.mxu0 %v929_v8  ;;  %v933_v25 = vld [vmem:[%s1189_s22 + $0x48] sm:$0xff]  ;;  %v932_v29 = vld [vmem:[%s1189_s22 + $0x40] sm:$0xff]  ;;  %v922_v33 = vld [vmem:[%s1281_s0 + $0xc] sm:$0xf0] }
  0x27   : > { %566 = vmatpush.bf16.msra.mxu1 %v937_v9  ;;  %v941_v26 = vld [vmem:[%s1189_s22 + $0x88] sm:$0xff]  ;;  %v940_v30 = vld [vmem:[%s1189_s22 + $0x80] sm:$0xff]  ;;  %v776_v35 = vld [vmem:[%s1281_s0 + $0x10] sm:$0xf0] }
  0x28   : > { %580 = vmatpush.bf16.msra.mxu2 %v945_v10  ;;  %v949_v27 = vld [vmem:[%s1189_s22 + $0xc8] sm:$0xff]  ;;  %v948_v31 = vld [vmem:[%s1189_s22 + $0xc0] sm:$0xff]  ;;  %v923_v37 = vld [vmem:[%s1281_s0 + $0x14] sm:$0xf0] }
  0x29   : > { %594 = vmatpush.bf16.msra.mxu3 %v953_v11  ;;  %v774_v32 = vld [vmem:[%s1281_s0] sm:$0xf]  ;;  %v920_v34 = vld [vmem:[%s1281_s0 + $0x4] sm:$0xf]  ;;  %v782_v36 = vld [vmem:[%s1281_s0 + $0x8] sm:$0xf] }
  0x2a   : > { %553 = vmatpush.bf16.msra.mxu0 %v928_v12  ;;  %v921_v38 = vld [vmem:[%s1281_s0 + $0xc] sm:$0xf]  ;;  %v784_v39 = vld [vmem:[%s1281_s0 + $0x18] sm:$0xf0]  ;;  %v775_v40 = vor.u32 %v922_v33, %v774_v32  ;;  %v779_v41 = vor.u32 %v920_v34, %v776_v35  ;;  %v783_v42 = vor.u32 %v923_v37, %v782_v36  ;;  %v1014_v50 = vld [vmem:[%s251_s23] ss:$0 sm:$0xff] }
  0x2b   : > { %567 = vmatpush.bf16.msra.mxu1 %v936_v13  ;;  %v787_v43 = vor.u32 %v921_v38, %v784_v39 }
  0x2c   : > { %581 = vmatpush.bf16.msra.mxu2 %v944_v14 }
  0x2d   : > { %595 = vmatpush.bf16.msra.mxu3 %v952_v15 }
  0x2e   : > { %554 = vmatpush.bf16.msra.mxu0 %v927_v16 }
  0x2f   : > { %568 = vmatpush.bf16.msra.mxu1 %v935_v17 }
  0x30   : > { %582 = vmatpush.bf16.msra.mxu2 %v943_v18 }
  0x31   : > { %596 = vmatpush.bf16.msra.mxu3 %v951_v19 }
  0x32   : > { %555 = vmatpush.bf16.msra.mxu0 %v926_v20 }
  0x33   : > { %569 = vmatpush.bf16.msra.mxu1 %v934_v21 }
  0x34   : > { %583 = vmatpush.bf16.msra.mxu2 %v942_v22 }
  0x35   : > { %597 = vmatpush.bf16.msra.mxu3 %v950_v23 }
  0x36   : > { %556 = vmatpush.bf16.msra.mxu0 %v925_v24 }
  0x37   : > { %570 = vmatpush.bf16.msra.mxu1 %v933_v25 }
  0x38   : > { %584 = vmatpush.bf16.msra.mxu2 %v941_v26 }
  0x39   : > { %598 = vmatpush.bf16.msra.mxu3 %v949_v27 }
  0x3a   : > { %557 = vmatpush.bf16.msra.mxu0 %v924_v28 }
  0x3b   : > { %571 = vmatpush.bf16.msra.mxu1 %v932_v29 }
  0x3c   : > { %585 = vmatpush.bf16.msra.mxu2 %v940_v30 }
  0x3d   : > { %599 = vmatpush.bf16.msra.mxu3 %v948_v31  ;;  %558 = vmatmul.bf16.vlgmr.msra.gmra.mxu0 %v775_v40 }
  0x3e   : > { %572 = vmatmul.bf16.vlgmr.msra.gmra.mxu1 %v779_v41 }
  0x3f   : > { %586 = vmatmul.bf16.vlgmr.msra.gmra.mxu2 %v783_v42 }
  0x40   : > { %600 = vmatmul.bf16.vlgmr.msra.gmra.mxu3 %v787_v43 }
  0xba   : > { %v559_v44 = vpop.f32.mrf.mxu0 }
  0xbb   : > { %v573_v45 = vpop.f32.mrf.mxu1 }
  0xbc   : > { %v574_v46 = vadd.f32 %v573_v45, %v559_v44 }
  0xc2   : > { %v587_v47 = vpop.f32.mrf.mxu2  ;;  %v561_v52 = vpop.f32.mrf.mxu0 }
  0xc3   : > { %v601_v48 = vpop.f32.mrf.mxu3  ;;  %v588_v49 = vadd.f32 %v587_v47, %v574_v46  ;;  %v575_v53 = vpop.f32.mrf.mxu1 }
  0xc4   : > { %v576_v55 = vadd.f32 %v575_v53, %v561_v52 }
  0xc5   : > { %v602_v51 = vadd.f32 %v601_v48, %v588_v49 }
  0xc7   : > { %v606_v54 = vadd.f32 %v1014_v50, %v602_v51 }
  0xc9   : > { %608 = vst [vmem:[%s240_s27] sm:$0xff] %v606_v54 }
  0xca   : > { %v589_v56 = vpop.f32.mrf.mxu2 }
  0xcb   : > { %v590_v57 = vadd.f32 %v589_v56, %v576_v55  ;;  %v603_v58 = vpop.f32.mrf.mxu3 }
  0xcd   : > { %v604_v59 = vadd.f32 %v603_v58, %v590_v57  ;;  %616 = sbr.rel (!%p1170_p9) target bundleno = 218 (0xda), region = 44 }
  0xcf   : > { %v607_v60 = vadd.f32 %v1014_v50, %v604_v59 }
  0xd0   : > { %v652_v61 = vld [vmem:[%s240_s27] sm:$0xff] (%p1170_p9) }
  0xd1   : > { %609 = vst [vmem:[%s240_s27 + $0x8] sm:$0xff] %v607_v60 }
  0xd2   : > { %653 = vst [vmem:[%s621_s30] sm:$0xff] %v652_v61 }
  0xd8   : > { %v654_v62 = vld [vmem:[%s240_s27 + $0x8] sm:$0xff] }
  0xd9   : > { %655 = vst [vmem:[%s621_s30 + $0x10] sm:$0xff] %v654_v62 }
  0xda PF: > { %s16_s17 = sadd.s32 1, %s1095_s17   ;;  %s1288_s12 = smov %s1079_s13 }
  0xdb   : > { %p13_p2 = scmp.ge.s32.totalorder %s16_s17, 4   ;;  %s1289_s13 = smov %s1083_s14 }
  0xdc   : > { %s1290_s14 = smov %s1168_s24  ;;  %s1291_s15 = smov %s1091_s16 }
  0xdd   : > { %s1292_s16 = smov %s1294_s19  ;;  %15 = sbr.rel (!%p13_p2) target bundleno = 4 (0x4), region = 121 }
  0xe2   :  { %671 = vsyncpa [#allocation3], 1 }
  0xe3   :  { %673 = vsyncpa [#allocation3 + $0x1], 1 }

</bundles_post_ra>
